<compile_context>
chip_gen: v6e
topology: v6e:2x2x1
jax: 0.10.0
libtpu: 0.0.40
codegen_flags: <defaults>
</compile_context>

<pallas_src>
import math
from functools import partial

import jax
import jax.numpy as jnp
from jax import lax
from jax.experimental import pallas as pl
from jax.experimental.pallas import tpu as pltpu


def _attention_kernel(enc_ref, w_ref, hp_ref, v_ref, out_ref, *, tile_b, hidden):
    # enc_ref: (T, TILE_B*H)  encoder outputs for TILE_B batch elements
    #                         (batch b lives in lane columns [b*H, (b+1)*H))
    # w_ref  : (H, H)         encoder part of the attn weight (W_enc)
    # hp_ref : (TILE_B, H)    hoisted hidden projection  h@W_h + a_h@W_ah + b
    # v_ref  : (1, H)         scoring vector
    # out_ref: (TILE_B, T)    softmax attention weights (T on lanes)
    w = w_ref[...]
    v = v_ref[...]

    rows = []
    for b in range(tile_b):                                   # static, unrolled
        enc_b = enc_ref[:, b * hidden:(b + 1) * hidden]       # (T, H) lane slice
        proj = jnp.dot(enc_b, w, preferred_element_type=jnp.float32)   # (T, H)
        energy = jnp.tanh(proj + hp_ref[b:b + 1, :])          # (T, H)
        # score row: contract H, leave T on lanes -> (1, T)
        rows.append(lax.dot_general(
            v, energy, (((1,), (1,)), ((), ())),
            preferred_element_type=jnp.float32))
    scores = rows[0] if tile_b == 1 else jnp.concatenate(rows, axis=0)  # (TILE_B, T)

    # numerically-stable softmax over T (lane axis)
    m = jnp.max(scores, axis=-1, keepdims=True)
    e = jnp.exp(scores - m)
    denom = jnp.sum(e, axis=-1, keepdims=True)
    p = e * pl.reciprocal(denom, approx=True)
    out_ref[...] = p.astype(out_ref.dtype)


def _pick_tile_b(B, H):
    if B <= 8:
        return B                      # whole batch in one grid step
    if B % 8 == 0 and (8 * H) % 128 == 0:
        return 8                      # fills sublanes, lane-aligned enc block
    return B                          # fallback: single step, full-array blocks


def attention_forward(encoder_outputs, last_time_hidden,
                      multi_de_last_time_hidden, w, b, v):
    """JAX wrapper reproducing Attention.forward semantics.

    encoder_outputs:            (T, B, H)
    last_time_hidden:           (1 or 2, B, H)
    multi_de_last_time_hidden:  (1 or 2, B, H)
    w: (3H, H) attn weight (transposed vs. torch Linear); b: (1, H); v: (1, H)
    returns:                    (B, 1, T) softmax over the time axis
    """
    T, B, H = encoder_outputs.shape

    # bidirectional: sum the two direction states (matches shape[0] == 2 branch)
    if last_time_hidden.shape[0] == 2:
        last_time_hidden = last_time_hidden[:1] + last_time_hidden[1:]
        multi_de_last_time_hidden = (multi_de_last_time_hidden[:1]
                                     + multi_de_last_time_hidden[1:])
    lt = last_time_hidden[0]                     # (B, H)
    ah = multi_de_last_time_hidden[0]            # (B, H)

    # Split the concatenated Linear weight and hoist the time-invariant part:
    #   x_cat @ W = h @ W_h + enc @ W_enc + a_h @ W_ah
    w_h, w_enc, w_ah = w[:H], w[H:2 * H], w[2 * H:]
    hidden_proj = (jnp.dot(lt, w_h, precision=lax.Precision.HIGHEST)
                   + jnp.dot(ah, w_ah, precision=lax.Precision.HIGHEST)
                   + b)                           # (B, H)

    enc2d = encoder_outputs.reshape(T, B * H)    # free row-major view, no copy

    tile_b = _pick_tile_b(B, H)
    grid = (B // tile_b,)

    kernel = partial(_attention_kernel, tile_b=tile_b, hidden=H)
    scores = pl.pallas_call(
        kernel,
        out_shape=jax.ShapeDtypeStruct((B, T), jnp.float32),
        grid=grid,
        in_specs=[
            pl.BlockSpec((T, tile_b * H), lambda bi: (0, bi)),   # enc slab
            pl.BlockSpec((H, H), lambda bi: (0, 0)),             # W_enc (resident)
            pl.BlockSpec((tile_b, H), lambda bi: (bi, 0)),       # hidden_proj
            pl.BlockSpec((1, H), lambda bi: (0, 0)),             # v (resident)
        ],
        out_specs=pl.BlockSpec((tile_b, T), lambda bi: (bi, 0)),
        compiler_params=pltpu.CompilerParams(
            dimension_semantics=("parallel",)),
    )(enc2d, w_enc, hidden_proj, v)

    return scores[:, None, :]                    # (B, 1, T)


if __name__ == "__main__":
    H, T, B = 32, 8, 2  # hidden_size, timesteps, batch

    key = jax.random.PRNGKey(0)
    k1, k2, k3, k4, k5, k6 = jax.random.split(key, 6)

    # nn.Linear(3H, H): weight stored here already transposed -> (3H, H)
    stdv_lin = 1.0 / math.sqrt(3 * H)
    w = jax.random.uniform(k1, (3 * H, H), jnp.float32, -stdv_lin, stdv_lin)
    b = jax.random.uniform(k2, (1, H), jnp.float32, -stdv_lin, stdv_lin)
    # self.v ~ U(-1/sqrt(H), 1/sqrt(H))
    stdv_v = 1.0 / math.sqrt(H)
    v = jax.random.uniform(k3, (1, H), jnp.float32, -stdv_v, stdv_v)

    encoder_outputs = jax.random.normal(k4, (T, B, H), jnp.float32)
    last_time_hidden = jax.random.normal(k5, (2, B, H), jnp.float32)
    multi_de_last_time_hidden = jax.random.normal(k6, (2, B, H), jnp.float32)

    out = attention_forward(encoder_outputs, last_time_hidden,
                            multi_de_last_time_hidden, w, b, v)
    out = jax.block_until_ready(out)

    # pure-JAX reference (original concatenated formulation)
    lt_r = last_time_hidden[:1] + last_time_hidden[1:]
    mh_r = multi_de_last_time_hidden[:1] + multi_de_last_time_hidden[1:]
    h_ref = jnp.broadcast_to(jnp.transpose(lt_r, (1, 0, 2)), (B, T, H))
    ah_ref = jnp.broadcast_to(jnp.transpose(mh_r, (1, 0, 2)), (B, T, H))
    e_ref = jnp.transpose(encoder_outputs, (1, 0, 2))
    x_ref = jnp.concatenate([h_ref, e_ref, ah_ref], axis=2)
    energy_ref = jnp.tanh(
        jnp.einsum("btk,kh->bth", x_ref, w,
                   precision=lax.Precision.HIGHEST) + b[0])
    scores_ref = jnp.einsum("bth,h->bt", energy_ref, v[0],
                            precision=lax.Precision.HIGHEST)
    ref = jax.nn.softmax(scores_ref, axis=1)[:, None, :]

    assert out.shape == (B, 1, T), out.shape
    assert jnp.allclose(out, ref, atol=5e-4, rtol=5e-4), (
        float(jnp.max(jnp.abs(out - ref))))
    print("KERNEL_OK")
</pallas_src>

<mosaic_0001>
module attributes {stable_mosaic.version = 11 : i64} {
  func.func @_attention_kernel(%arg0: i32, %arg1: memref<8x64xf32, #tpu.memory_space<vmem>>, %arg2: memref<32x32xf32, #tpu.memory_space<vmem>>, %arg3: memref<2x32xf32, #tpu.memory_space<vmem>>, %arg4: memref<1x32xf32, #tpu.memory_space<vmem>>, %arg5: memref<2x8xf32, #tpu.memory_space<vmem>>) attributes {dimension_semantics = [#tpu.dimension_semantics<parallel>], iteration_bounds = array<i64: 1>, scalar_prefetch = 0 : i64, scratch_operands = 0 : i64, tpu.core_type = #tpu.core_type<tc>, window_params = [{transform_indices = @transform_0, window_bounds = array<i64: 8, 64>}, {pipeline_mode = #tpu.pipeline_mode<synchronous>, transform_indices = @transform_1, window_bounds = array<i64: 32, 32>}, {transform_indices = @transform_2, window_bounds = array<i64: 2, 32>}, {pipeline_mode = #tpu.pipeline_mode<synchronous>, transform_indices = @transform_3, window_bounds = array<i64: 1, 32>}, {transform_indices = @transform_4, window_bounds = array<i64: 2, 8>}]} {
    %c0 = arith.constant 0 : index
    %c0_0 = arith.constant 0 : index
    %0 = vector.load %arg2[%c0, %c0_0] : memref<32x32xf32, #tpu.memory_space<vmem>>, vector<32x32xf32>
    %c0_1 = arith.constant 0 : index
    %c0_2 = arith.constant 0 : index
    %1 = vector.load %arg4[%c0_1, %c0_2] : memref<1x32xf32, #tpu.memory_space<vmem>>, vector<1x32xf32>
    %c0_3 = arith.constant 0 : index
    %c0_4 = arith.constant 0 : index
    %2 = vector.load %arg1[%c0_3, %c0_4] : memref<8x64xf32, #tpu.memory_space<vmem>>, vector<8x32xf32>
    %cst = arith.constant dense<0.000000e+00> : vector<8x32xf32>
    %3 = tpu.matmul %2, %0, %cst {dimension_numbers = #tpu.dot_dimension_numbers<[1], [0], [0], [1], [0, 0, 1, 1], [], []>} : vector<8x32xf32>, vector<32x32xf32>, vector<8x32xf32> -> vector<8x32xf32>
    %c0_5 = arith.constant 0 : index
    %c0_6 = arith.constant 0 : index
    %4 = vector.load %arg3[%c0_5, %c0_6] : memref<2x32xf32, #tpu.memory_space<vmem>>, vector<1x32xf32>
    %5 = vector.broadcast %4 : vector<1x32xf32> to vector<8x32xf32>
    %6 = arith.addf %3, %5 : vector<8x32xf32>
    %7 = math.tanh %6 : vector<8x32xf32>
    %cst_7 = arith.constant dense<0.000000e+00> : vector<1x8xf32>
    %8 = tpu.matmul %1, %7, %cst_7 {dimension_numbers = #tpu.dot_dimension_numbers<[1], [1], [0], [0], [0, 0, 1, 0], [], []>} : vector<1x32xf32>, vector<8x32xf32>, vector<1x8xf32> -> vector<1x8xf32>
    %c0_8 = arith.constant 0 : index
    %c32 = arith.constant 32 : index
    %9 = vector.load %arg1[%c0_8, %c32] : memref<8x64xf32, #tpu.memory_space<vmem>>, vector<8x32xf32>
    %cst_9 = arith.constant dense<0.000000e+00> : vector<8x32xf32>
    %10 = tpu.matmul %9, %0, %cst_9 {dimension_numbers = #tpu.dot_dimension_numbers<[1], [0], [0], [1], [0, 0, 1, 1], [], []>} : vector<8x32xf32>, vector<32x32xf32>, vector<8x32xf32> -> vector<8x32xf32>
    %c1 = arith.constant 1 : index
    %c0_10 = arith.constant 0 : index
    %11 = vector.load %arg3[%c1, %c0_10] : memref<2x32xf32, #tpu.memory_space<vmem>>, vector<1x32xf32>
    %12 = vector.broadcast %11 : vector<1x32xf32> to vector<8x32xf32>
    %13 = arith.addf %10, %12 : vector<8x32xf32>
    %14 = math.tanh %13 : vector<8x32xf32>
    %cst_11 = arith.constant dense<0.000000e+00> : vector<1x8xf32>
    %15 = tpu.matmul %1, %14, %cst_11 {dimension_numbers = #tpu.dot_dimension_numbers<[1], [1], [0], [0], [0, 0, 1, 0], [], []>} : vector<1x32xf32>, vector<8x32xf32>, vector<1x8xf32> -> vector<1x8xf32>
    %16 = tpu.concatenate %8, %15 in 0 : vector<1x8xf32>, vector<1x8xf32> -> vector<2x8xf32>
    %cst_12 = arith.constant dense<0xFF800000> : vector<2xf32>
    %17 = vector.multi_reduction <maximumf>, %16, %cst_12 [1] : vector<2x8xf32> to vector<2xf32>
    %18 = vector.shape_cast %17 : vector<2xf32> to vector<2x1xf32>
    %19 = vector.broadcast %18 : vector<2x1xf32> to vector<2x8xf32>
    %20 = arith.subf %16, %19 : vector<2x8xf32>
    %21 = math.exp %20 : vector<2x8xf32>
    %cst_13 = arith.constant dense<0.000000e+00> : vector<2xf32>
    %22 = vector.multi_reduction <add>, %21, %cst_13 [1] : vector<2x8xf32> to vector<2xf32>
    %23 = vector.shape_cast %22 : vector<2xf32> to vector<2x1xf32>
    %24 = tpu.reciprocal %23 {approx = true} : vector<2x1xf32> -> vector<2x1xf32>
    %25 = vector.broadcast %24 : vector<2x1xf32> to vector<2x8xf32>
    %26 = arith.mulf %21, %25 : vector<2x8xf32>
    %c0_14 = arith.constant 0 : index
    %c0_15 = arith.constant 0 : index
    %27 = vector.load %arg5[%c0_14, %c0_15] : memref<2x8xf32, #tpu.memory_space<vmem>>, vector<2x8xf32>
    tpu.vector_store %arg5[%c0_14, %c0_15], %26 {strides = array<i32>} : memref<2x8xf32, #tpu.memory_space<vmem>>, vector<2x8xf32>,
    return
  }
  func.func @transform_0(%arg0: i32) -> (i32, i32) {
    %c0_i32 = arith.constant 0 : i32
    %c0_i32_0 = arith.constant 0 : i32
    return %c0_i32, %arg0 : i32, i32
  }
  func.func @transform_1(%arg0: i32) -> (i32, i32) {
    %c0_i32 = arith.constant 0 : i32
    %c0_i32_0 = arith.constant 0 : i32
    %c0_i32_1 = arith.constant 0 : i32
    return %c0_i32, %c0_i32_0 : i32, i32
  }
  func.func @transform_2(%arg0: i32) -> (i32, i32) {
    %c0_i32 = arith.constant 0 : i32
    %c0_i32_0 = arith.constant 0 : i32
    return %arg0, %c0_i32 : i32, i32
  }
  func.func @transform_3(%arg0: i32) -> (i32, i32) {
    %c0_i32 = arith.constant 0 : i32
    %c0_i32_0 = arith.constant 0 : i32
    %c0_i32_1 = arith.constant 0 : i32
    return %c0_i32, %c0_i32_0 : i32, i32
  }
  func.func @transform_4(%arg0: i32) -> (i32, i32) {
    %c0_i32 = arith.constant 0 : i32
    %c0_i32_0 = arith.constant 0 : i32
    return %arg0, %c0_i32 : i32, i32
  }
}

</mosaic_0001>

<bundles_post_ra>
// kernel: tpu_custom_call.1
= control target key start
LH: loop header
LB: loop body
LE: loop exit
PB: predicated region body
PF: predicated region fallthrough
CT: control target
= control target key end

     0   :  { %9 = vsyncpa [#allocation3], 0  ;;  %s593_s0 = inlined_call_operand.hbm [shape: f32[8,64], index: 0, kind: input, shape index: {}]   ;;  %s594_s1 = inlined_call_operand.hbm [shape: f32[32,32], index: 1, kind: input, shape index: {}]   ;;  %s595_s2 = inlined_call_operand.vmem [shape: f32[2,32], index: 2, kind: input, shape index: {}]   ;;  %s596_s3 = inlined_call_operand.vmem [shape: f32[1,32], index: 3, kind: input, shape index: {}]   ;;  %s597_s4 = inlined_call_operand.hbm [shape: f32[2,8], index: 4, kind: output, shape index: {}]  }
   0x1   :  { %10 = vsyncpa [#allocation6], 0 }
   0x2   :  { %11 = vsyncpa [#allocation4], 0  ;;  %s529_s15 = smov [#allocation2]   ;;  %s530_s17 = smov [#allocation5]  }
   0x3   :  { %s18_s16 = sshll.u32 %s529_s15, 4  ;;  %s27_s18 = sshll.u32 %s530_s17, 4  ;;  %s19_s16 = int_to_ptr.vmem [resolvable:$true] %s18_s16  ;;  %s28_s18 = int_to_ptr.vmem [resolvable:$true] %s27_s18 }
   0x4   :  { %s471_s19 = scalar_lea.vmem %s19_s16, 128  ;;  %p476_p1 = scmp.lt.s32.totalorder %s19_s16, %s19_s16 }
   0x5   :  { %p472_p0 = scmp.ne.s32.totalorder %s19_s16, %s471_s19  ;;  %p477_p2 = scmp.lt.s32.totalorder %s471_s19, %s471_s19 }
   0x7   :  { %p478_p3 = por %p477_p2, %p476_p1 }
   0x9   :  { %p479_p4 = pnand %p478_p3, %p472_p0 }
   0xb   :  { %482 = shalt.err (!%p479_p4)
}
   0xc   :  { %21 = dma.hbm_to_vmem [thread:$0]  %s593_s0, 128, %s19_s16, [#allocation3]  }
   0xd   :  { %s491_s22 = scalar_lea.vmem %s28_s18, 512  ;;  %p496_p6 = scmp.lt.s32.totalorder %s28_s18, %s28_s18 }
   0xe   :  { %p492_p5 = scmp.ne.s32.totalorder %s28_s18, %s491_s22  ;;  %p497_p7 = scmp.lt.s32.totalorder %s491_s22, %s491_s22 }
  0x10   :  { %p498_p8 = por %p497_p7, %p496_p6 }
  0x12   :  { %p499_p9 = pnand %p498_p8, %p492_p5 }
  0x14   :  { %502 = shalt.err (!%p499_p9)
}
  0x15   :  { %s531_s23 = smov 128   ;;  %s532_s24 = smov 8  }
  0x16   :  { %33 = dma.hbm_to_vmem [thread:$0]  %s594_s1, 512, %s28_s18, [#allocation6], %s531_s23, %s531_s23, %s532_s24  }
  0x17   :  { %523 = dma.done.wait [#allocation3], 128  }
  0x18   :  { %524 = vsyncadd [#allocation3], 4294967168 }
  0x19   :  { %525 = dma.done.wait [#allocation6], 512  }
  0x1a   :  { %526 = vsyncadd [#allocation6], 4294966784  ;;  %v533_v0 = vmov 0.0   ;;  %vm534_vm0 = vmmov 0   ;;  %v47_v1 = vld [vmem:[#allocation5 + $0x18] sm:$0xff]  ;;  %v46_v2 = vld [vmem:[#allocation5 + $0x10] sm:$0xff] }
  0x1b   :  { %415 = vmatprep.subr.mxu0 %v533_v0  ;;  %423 = vmatprep.mubr.msk.f32.mxu0 %vm534_vm0, %v533_v0  ;;  %v49_v3 = vld [vmem:[#allocation2] sm:$0xff]  ;;  %v45_v4 = vld [vmem:[#allocation5 + $0x8] sm:$0xff]  ;;  %s535_s0 = smov 96   ;;  %v44_v5 = vld [vmem:[#allocation5] sm:$0xff]  ;;  %vm55_vm1 = vcmask 261120   ;;  %vm362_vm2 = vcmask 1040384  }
  0x1c   :  { %426 = vmatprep.subr.mxu1 %v533_v0  ;;  %428 = vmatprep.mubr.msk.f32.mxu1 %vm534_vm0, %v533_v0  ;;  %v393_v6 = vld [vmem:[%s595_s2] ss:$0 sm:$0xff]  ;;  %v397_v15 = vld [vmem:[%s595_s2 + $0x1] ss:$0 sm:$0xff]  ;;  %vm364_vm3 = vcmask 58368   ;;  %s536_s2 = smov [#allocation7]  }
  0x1d   :  { %416 = vmatpush3.msra.mxu0 %v47_v1  ;;  %211 = vrot.lane.b32.xlu0 %v49_v3, %s535_s0  ;;  %v48_v11 = vld [vmem:[%s596_s3] sm:$0x1]  ;;  %s383_s3 = sshll.u32 %s536_s2, 4  ;;  %s384_s3 = int_to_ptr.vmem [resolvable:$true] %s383_s3 }
  0x1e   :  { %417 = vmatprep.subr.mxu0 %v533_v0  ;;  %s503_s6 = scalar_lea.vmem %s384_s3, 32  ;;  %p508_p11 = scmp.lt.s32.totalorder %s384_s3, %s384_s3 }
  0x1f   :  { %418 = vmatpush3.msra.mxu0 %v46_v2  ;;  %p504_p10 = scmp.ne.s32.totalorder %s384_s3, %s503_s6  ;;  %p509_p12 = scmp.lt.s32.totalorder %s503_s6, %s503_s6 }
  0x20   :  { %419 = vmatprep.subr.mxu0 %v533_v0 }
  0x21   :  { %420 = vmatpush3.msra.mxu0 %v45_v4  ;;  %p510_p13 = por %p509_p12, %p508_p11 }
  0x22   :  { %421 = vmatprep.subr.mxu0 %v533_v0 }
  0x23   :  { %422 = vmatpush3.msra.mxu0 %v44_v5  ;;  %p511_p0 = pnand %p510_p13, %p504_p10 }
  0x24   :  { %424 = vmatmul.mubr.msk.f32.vlgmr.msra.gmra.mxu0 %vm55_vm1, %v49_v3  ;;  %442 = vmatprep.subr.mxu0 %v533_v0 }
  0x25   :  { %444 = vmatprep.mubr.msk.f32.mxu0 %vm534_vm0, %v533_v0 }
  0x8f   :  { %v212_v12 = vpop.permute.xlu0 %211 }
  0xe4   :  { %v125_v7 = vpop.f32.mrf.mxu0 }
  0xe5   :  { %v126_v8 = vadd.f32 %v393_v6, %v125_v7 }
  0xe6   :  { %v425_v9 = vpop.f32.mrf.mxu0 }
  0xe7   :  { %455 = vtanh.f32 %v126_v8 }
  0xf4   :  { %v456_v10 = vpop.eup %455 }
  0xf5   :  { %427 = vmatpush3.xpose.msk.msra.mxu1 %vm55_vm1, %v456_v10 }
  0xf6   :  { %431 = vmatprep.subr.mxu1 %v533_v0 }
  0xf8   :  { %429 = vmatmul.mubr.msk.f32.vlgmr.msra.gmra.mxu1 %vm55_vm1, %v48_v11 }
  0xf9   :  { %432 = vmatpush3.msra.mxu1 %v47_v1  ;;  %439 = vmatprep.mubr.msk.f32.mxu1 %vm534_vm0, %v533_v0 }
  0xfa   :  { %433 = vmatprep.subr.mxu1 %v533_v0 }
  0xfb   :  { %434 = vmatpush3.msra.mxu1 %v46_v2 }
  0xfc   :  { %435 = vmatprep.subr.mxu1 %v533_v0 }
  0xfd   :  { %436 = vmatpush3.msra.mxu1 %v45_v4 }
  0xfe   :  { %437 = vmatprep.subr.mxu1 %v533_v0 }
  0xff   :  { %438 = vmatpush3.msra.mxu1 %v44_v5 }
 0x100   :  { %440 = vmatmul.mubr.msk.f32.vlgmr.msra.gmra.mxu1 %vm55_vm1, %v212_v12 }
 0x1b8   :  { %v202_v13 = vpop.f32.mrf.mxu1 }
 0x1ba   :  { %v430_v14 = vpop.f32.mrf.mxu1 }
 0x1c0   :  { %v281_v16 = vpop.f32.mrf.mxu1 }
 0x1c1   :  { %v282_v17 = vadd.f32 %v397_v15, %v281_v16 }
 0x1c2   :  { %v441_v18 = vpop.f32.mrf.mxu1 }
 0x1c3   :  { %457 = vtanh.f32 %v282_v17 }
 0x1d0   :  { %v458_v19 = vpop.eup %457 }
 0x1d1   :  { %443 = vmatpush3.xpose.msk.msra.mxu0 %vm55_vm1, %v458_v19 }
 0x1d4   :  { %445 = vmatmul.mubr.msk.f32.vlgmr.msra.gmra.mxu0 %vm55_vm1, %v48_v11 }
 0x294   :  { %v355_v20 = vpop.f32.mrf.mxu0 }
 0x295   :  { %v360_v21 = vrot.slane %v355_v20, 7 }
 0x296   :  { %v446_v22 = vpop.f32.mrf.mxu0 }
 0x297   :  { %v363_v23 = vsel %vm362_vm2, %v202_v13, %v360_v21 }
 0x298   :  { %v365_v24 = vsel %vm364_vm3, %v363_v23, -inf }
 0x299   :  { %366 = vmax.xlane.f32.xlu0 %v365_v24 }
 0x322   :  { %v367_v25 = vpop.xlane.xlu0 %366 }
 0x323   :  { %v368_v26 = vsub.f32 %v363_v23, %v367_v25 }
 0x325   :  { %v369_v27 = vmul.f32 1.442695, %v368_v26 }
 0x327   :  { %459 = vpow2.f32 %v369_v27 }
 0x334   :  { %v460_v28 = vpop.eup %459 }
 0x335   :  { %v371_v29 = vsel %vm364_vm3, %v460_v28, 0.0 }
 0x336   :  { %372 = vadd.xlane.f32.xlu1 %v371_v29 }
 0x3bf   :  { %v373_v30 = vpop.xlane.xlu1 %372 }
 0x3c0   :  { %461 = vrcp.f32 %v373_v30 }
 0x3cd   :  { %v462_v31 = vpop.eup %461 }
 0x3ce   :  { %v375_v32 = vmul.f32 %v462_v31, %v460_v28 }
 0x3d0   :  { %376 = vst.msk [vmem:[#allocation7] sm:$0x3] %vm364_vm3, %v375_v32 }
 0x3d1   :  { %514 = shalt.err (!%p511_p0)
}
 0x3d2   :  { %386 = dma.vmem_to_hbm [thread:$0]  %s384_s3, 32, %s597_s4, [#allocation4]  }
 0x3d3   :  { %527 = dma.done.wait [#allocation4], 32  }
 0x3d4   :  { %528 = vsyncadd [#allocation4], 4294967264 }
 0x3d5   :  { %390 = vsyncpa [#allocation3], 1 }
 0x3d6   :  { %391 = vsyncpa [#allocation6], 1 }
 0x3d7   :  { %392 = vsyncpa [#allocation4], 1 }

</bundles_post_ra>
